<compile_context>
chip_gen: v7x
topology: tpu7x:2x2x1
jax: 0.10.0
libtpu: 0.0.40
codegen_flags: <defaults>
</compile_context>

<pallas_src>
import functools
import math

import jax
import jax.numpy as jnp
from jax.experimental import pallas as pl
from jax.experimental.pallas import tpu as pltpu

LEAKY_SLOPE = 0.01  # torch.nn.LeakyReLU default negative_slope


def _leaky_relu(x):
    return jnp.where(x > 0, x, LEAKY_SLOPE * x)


def _skip_at(skip_connections, i):
    """Mirror PyTorch: bool -> use directly; int -> (i % skip_connections) == 0."""
    if isinstance(skip_connections, bool):
        return skip_connections
    if isinstance(skip_connections, int):
        return (i % skip_connections) == 0
    return False


def leapfrog_repeat_kernel(*refs, n_extra, act0, fold_skip, act_extra, skip_extra):
    """One batch tile of the whole (folded) MLP, batch-major throughout.

    refs = (x_ref, w0t, b0, s1, b1, [wT_2, b_2, ...], out_ref)
      x_ref : (TILE_N, D0)    batch-major, straight from HBM (no wrapper transpose)
      w0t   : (D0, 1)         leapfrog head, transposed
      b0    : (1, 1)
      s1    : (1, ks[2])      rowsum(W1): folded repeat_interleave + linear[1]
      b1    : (1, ks[2])
      wT_j  : (in_j, out_j)   remaining layers, transposed; VMEM-resident
      b_j   : (1, out_j)
      out   : (TILE_N, out_dim)
    """
    x_ref = refs[0]
    w0t_ref, b0_ref, s1_ref, b1_ref = refs[1:5]
    extra = refs[5:5 + 2 * n_extra]
    out_ref = refs[5 + 2 * n_extra]

    x = x_ref[...].astype(jnp.float32)                                  # (TN, D0)

    # leapfrog Linear(ks0 -> 1): rank-1 head, one skinny matmul per tile.
    h0 = jnp.dot(x, w0t_ref[...], preferred_element_type=jnp.float32)   # (TN, 1)
    h0 = h0 + b0_ref[...]

    # repeat_interleave(ks1) + Linear(ks1 -> ks2) fold: pure VPU broadcast.
    y = h0 * s1_ref[...] + b1_ref[...]                                  # (TN, ks2)
    if act0:
        y = _leaky_relu(y)
    if fold_skip:
        y = y + h0                       # skip adds the repeated leapfrog output
    h = y

    for j in range(n_extra):
        w = extra[2 * j][...]            # (in, out)
        b = extra[2 * j + 1][...]        # (1, out)
        y = jnp.dot(h, w, preferred_element_type=jnp.float32) + b
        if act_extra[j]:
            y = _leaky_relu(y)
        if skip_extra[j]:
            y = y + h
        h = y

    out_ref[...] = h.astype(out_ref.dtype)                              # (TN, out_dim)


def init_params(key, ks):
    """PyTorch-convention params: layer0 is (1, ks[0]); layer i>=1 is (ks[i+1], ks[i])."""
    dims = [(1, ks[0])] + [(ks[i + 1], ks[i]) for i in range(1, len(ks) - 1)]
    params = []
    for (d_out, d_in) in dims:
        key, kw, kb = jax.random.split(key, 3)
        bound = 1.0 / math.sqrt(d_in)
        w = jax.random.uniform(kw, (d_out, d_in), jnp.float32, -bound, bound)
        b = jax.random.uniform(kb, (d_out,), jnp.float32, -bound, bound)
        params.append((w, b))
    return params


def prepare_leapfrog_params(params, ks, skip_connections=False):
    """Hoisted per-parameter-update preprocessing (done once, not per forward call)."""
    assert len(ks) >= 3, "folded kernel needs at least linear[0] and linear[1]"
    n_lin = len(params)
    assert n_lin == len(ks) - 1

    w0, b0 = params[0]                                          # (1, ks0), (1,)
    w1, b1 = params[1]                                          # (ks2, ks1), (ks2,)
    w0t = jnp.asarray(w0, jnp.float32).T                        # (ks0, 1)
    b0r = jnp.asarray(b0, jnp.float32).reshape(1, 1)            # (1, 1)
    s1 = jnp.sum(jnp.asarray(w1, jnp.float32), axis=1).reshape(1, -1)   # (1, ks2)
    b1r = jnp.asarray(b1, jnp.float32).reshape(1, -1)           # (1, ks2)

    operands = [w0t, b0r, s1, b1r]
    for (w, b) in params[2:]:
        operands.append(jnp.asarray(w, jnp.float32).T)          # (in, out)
        operands.append(jnp.asarray(b, jnp.float32).reshape(1, -1))

    n_extra = n_lin - 2
    act0 = n_lin >= 3                     # layer 1 is a "block" only if a final layer follows
    fold_skip = bool(act0 and _skip_at(skip_connections, 1) and ks[1] == ks[2])
    act_extra = tuple((j + 2) <= n_lin - 2 for j in range(n_extra))
    skip_extra = tuple(
        act_extra[j] and _skip_at(skip_connections, j + 2) and ks[j + 2] == ks[j + 3]
        for j in range(n_extra)
    )
    cfg = dict(n_extra=n_extra, act0=act0, fold_skip=fold_skip,
               act_extra=act_extra, skip_extra=skip_extra,
               d0=ks[0], out_dim=ks[-1])
    return {"operands": tuple(operands), "config": cfg}


def leapfrog_repeat_forward(x, prepared, *, tile_n=8192):
    ops = prepared["operands"]
    cfg = prepared["config"]
    n, d0 = x.shape
    assert d0 == cfg["d0"]
    out_dim = cfg["out_dim"]
    n_extra = cfg["n_extra"]

    # Tile sizing: big tiles to amortize per-grid-step overhead, but guarantee
    # >= 2 grid steps when N allows so both v7x TensorCores get a batch shard.
    cap = max(8, ((-(-n // 2)) // 8) * 8)          # ~ceil(n/2), multiple of 8
    tile = max(8, min(int(tile_n), cap))
    if tile >= n:
        tile = n                                   # single full-extent block
    grid = (pl.cdiv(n, tile),)

    in_specs = [pl.BlockSpec((tile, d0), lambda i: (i, 0))]              # x, batch-major
    in_specs += [pl.BlockSpec(o.shape, lambda i: (0, 0)) for o in ops]   # resident params
    out_spec = pl.BlockSpec((tile, out_dim), lambda i: (i, 0))           # batch-major out

    flops_row = 2 * d0 + 2 * ops[2].shape[1]
    for j in range(n_extra):
        w = ops[4 + 2 * j]
        flops_row += 2 * int(w.shape[0]) * int(w.shape[1])
    param_bytes = sum(int(o.size) * 4 for o in ops)
    cost = pl.CostEstimate(
        flops=int(flops_row) * int(n),
        transcendentals=0,
        bytes_accessed=int(4 * n * (d0 + out_dim) + param_bytes),
    )

    kernel = functools.partial(
        leapfrog_repeat_kernel,
        n_extra=n_extra, act0=cfg["act0"], fold_skip=cfg["fold_skip"],
        act_extra=cfg["act_extra"], skip_extra=cfg["skip_extra"],
    )

    return pl.pallas_call(
        kernel,
        out_shape=jax.ShapeDtypeStruct((n, out_dim), jnp.float32),
        grid=grid,
        in_specs=in_specs,
        out_specs=out_spec,
        compiler_params=pltpu.CompilerParams(
            dimension_semantics=("parallel",),       # shard batch tiles across v7x TCs
            vmem_limit_bytes=32 * 1024 * 1024,       # <=16 MiB of blocks at tile=8192
        ),
        cost_estimate=cost,
    )(x, *ops)


def reference_forward(x, params, ks, skip_connections=False):
    """Plain-JAX reference mirroring the PyTorch forward (unfolded)."""
    w0, b0 = params[0]
    h = x @ w0.T + b0                                # (N, 1)
    h = jnp.repeat(h, ks[1], axis=1)                 # repeat_interleave(dim=1)
    n_linear = len(params)
    for i in range(1, n_linear - 1):
        w, b = params[i]
        y = _leaky_relu(h @ w.T + b)
        if _skip_at(skip_connections, i) and y.shape == h.shape:
            y = y + h
        h = y
    if n_linear > 1:
        w, b = params[-1]
        h = h @ w.T + b
    return h


if __name__ == "__main__":
    # Small shapes consistent with the module: ks = [in, hidden, hidden, out]
    ks = [16, 32, 32, 8]

    key = jax.random.PRNGKey(0)
    key, kx = jax.random.split(key)
    params = init_params(key, ks)

    # even batch (exact tiles) and ragged batch (partial last block)
    for batch in (256, 200):
        x = jax.random.normal(jax.random.fold_in(kx, batch), (batch, ks[0]), jnp.float32)
        for skip in (False, True):   # module default is False; also exercise skips
            prepared = prepare_leapfrog_params(params, ks, skip_connections=skip)
            out = leapfrog_repeat_forward(x, prepared)
            out = jax.block_until_ready(out)
            ref = reference_forward(x, params, ks, skip_connections=skip)
            assert out.shape == (batch, ks[-1]), out.shape
            err = float(jnp.max(jnp.abs(out - ref)))
            assert err < 1e-4, (batch, skip, err)

    print("KERNEL_OK")
</pallas_src>

<mosaic_0001>
module attributes {stable_mosaic.version = 11 : i64} {
  func.func @leapfrog_repeat_kernel(%arg0: i32, %arg1: memref<128x16xf32, #tpu.memory_space<vmem>>, %arg2: memref<16x1xf32, #tpu.memory_space<vmem>>, %arg3: memref<1x1xf32, #tpu.memory_space<vmem>>, %arg4: memref<1x32xf32, #tpu.memory_space<vmem>>, %arg5: memref<1x32xf32, #tpu.memory_space<vmem>>, %arg6: memref<32x8xf32, #tpu.memory_space<vmem>>, %arg7: memref<1x8xf32, #tpu.memory_space<vmem>>, %arg8: memref<128x8xf32, #tpu.memory_space<vmem>>) attributes {dimension_semantics = [#tpu.dimension_semantics<parallel>], iteration_bounds = array<i64: 2>, scalar_prefetch = 0 : i64, scratch_operands = 0 : i64, tpu.core_type = #tpu.core_type<tc>, window_params = [{transform_indices = @transform_0, window_bounds = array<i64: 128, 16>}, {pipeline_mode = #tpu.pipeline_mode<synchronous>, transform_indices = @transform_1, window_bounds = array<i64: 16, 1>}, {pipeline_mode = #tpu.pipeline_mode<synchronous>, transform_indices = @transform_2, window_bounds = array<i64: 1, 1>}, {pipeline_mode = #tpu.pipeline_mode<synchronous>, transform_indices = @transform_3, window_bounds = array<i64: 1, 32>}, {pipeline_mode = #tpu.pipeline_mode<synchronous>, transform_indices = @transform_4, window_bounds = array<i64: 1, 32>}, {pipeline_mode = #tpu.pipeline_mode<synchronous>, transform_indices = @transform_5, window_bounds = array<i64: 32, 8>}, {pipeline_mode = #tpu.pipeline_mode<synchronous>, transform_indices = @transform_6, window_bounds = array<i64: 1, 8>}, {transform_indices = @transform_7, window_bounds = array<i64: 128, 8>}]} {
    %c0 = arith.constant 0 : index
    %c0_0 = arith.constant 0 : index
    %0 = vector.load %arg1[%c0, %c0_0] : memref<128x16xf32, #tpu.memory_space<vmem>>, vector<128x16xf32>
    %c0_1 = arith.constant 0 : index
    %c0_2 = arith.constant 0 : index
    %1 = vector.load %arg2[%c0_1, %c0_2] : memref<16x1xf32, #tpu.memory_space<vmem>>, vector<16x1xf32>
    %cst = arith.constant dense<0.000000e+00> : vector<128x1xf32>
    %2 = tpu.matmul %0, %1, %cst {dimension_numbers = #tpu.dot_dimension_numbers<[1], [0], [0], [1], [0, 0, 1, 1], [], []>} : vector<128x16xf32>, vector<16x1xf32>, vector<128x1xf32> -> vector<128x1xf32>
    %c0_3 = arith.constant 0 : index
    %c0_4 = arith.constant 0 : index
    %3 = vector.load %arg3[%c0_3, %c0_4] : memref<1x1xf32, #tpu.memory_space<vmem>>, vector<1x1xf32>
    %4 = vector.broadcast %3 : vector<1x1xf32> to vector<128x1xf32>
    %5 = arith.addf %2, %4 : vector<128x1xf32>
    %c0_5 = arith.constant 0 : index
    %c0_6 = arith.constant 0 : index
    %6 = vector.load %arg4[%c0_5, %c0_6] : memref<1x32xf32, #tpu.memory_space<vmem>>, vector<1x32xf32>
    %7 = vector.broadcast %5 : vector<128x1xf32> to vector<128x32xf32>
    %8 = vector.broadcast %6 : vector<1x32xf32> to vector<128x32xf32>
    %9 = arith.mulf %7, %8 : vector<128x32xf32>
    %c0_7 = arith.constant 0 : index
    %c0_8 = arith.constant 0 : index
    %10 = vector.load %arg5[%c0_7, %c0_8] : memref<1x32xf32, #tpu.memory_space<vmem>>, vector<1x32xf32>
    %11 = vector.broadcast %10 : vector<1x32xf32> to vector<128x32xf32>
    %12 = arith.addf %9, %11 : vector<128x32xf32>
    %cst_9 = arith.constant 0.000000e+00 : f32
    %13 = vector.broadcast %cst_9 : f32 to vector<128x32xf32>
    %14 = arith.cmpf ogt, %12, %13 : vector<128x32xf32>
    %cst_10 = arith.constant 0.00999999977 : f32
    %15 = vector.broadcast %cst_10 : f32 to vector<128x32xf32>
    %16 = arith.mulf %15, %12 : vector<128x32xf32>
    %17 = arith.select %14, %12, %16 : vector<128x32xi1>, vector<128x32xf32>
    %c0_11 = arith.constant 0 : index
    %c0_12 = arith.constant 0 : index
    %18 = vector.load %arg6[%c0_11, %c0_12] : memref<32x8xf32, #tpu.memory_space<vmem>>, vector<32x8xf32>
    %c0_13 = arith.constant 0 : index
    %c0_14 = arith.constant 0 : index
    %19 = vector.load %arg7[%c0_13, %c0_14] : memref<1x8xf32, #tpu.memory_space<vmem>>, vector<1x8xf32>
    %cst_15 = arith.constant dense<0.000000e+00> : vector<128x8xf32>
    %20 = tpu.matmul %17, %18, %cst_15 {dimension_numbers = #tpu.dot_dimension_numbers<[1], [0], [0], [1], [0, 0, 1, 1], [], []>} : vector<128x32xf32>, vector<32x8xf32>, vector<128x8xf32> -> vector<128x8xf32>
    %21 = vector.broadcast %19 : vector<1x8xf32> to vector<128x8xf32>
    %22 = arith.addf %20, %21 : vector<128x8xf32>
    %c0_16 = arith.constant 0 : index
    %c0_17 = arith.constant 0 : index
    %23 = vector.load %arg8[%c0_16, %c0_17] : memref<128x8xf32, #tpu.memory_space<vmem>>, vector<128x8xf32>
    tpu.vector_store %arg8[%c0_16, %c0_17], %22 {strides = array<i32>} : memref<128x8xf32, #tpu.memory_space<vmem>>, vector<128x8xf32>,
    return
  }
  func.func @transform_0(%arg0: i32) -> (i32, i32) {
    %c0_i32 = arith.constant 0 : i32
    %c0_i32_0 = arith.constant 0 : i32
    return %arg0, %c0_i32 : i32, i32
  }
  func.func @transform_1(%arg0: i32) -> (i32, i32) {
    %c0_i32 = arith.constant 0 : i32
    %c0_i32_0 = arith.constant 0 : i32
    %c0_i32_1 = arith.constant 0 : i32
    return %c0_i32, %c0_i32_0 : i32, i32
  }
  func.func @transform_2(%arg0: i32) -> (i32, i32) {
    %c0_i32 = arith.constant 0 : i32
    %c0_i32_0 = arith.constant 0 : i32
    %c0_i32_1 = arith.constant 0 : i32
    return %c0_i32, %c0_i32_0 : i32, i32
  }
  func.func @transform_3(%arg0: i32) -> (i32, i32) {
    %c0_i32 = arith.constant 0 : i32
    %c0_i32_0 = arith.constant 0 : i32
    %c0_i32_1 = arith.constant 0 : i32
    return %c0_i32, %c0_i32_0 : i32, i32
  }
  func.func @transform_4(%arg0: i32) -> (i32, i32) {
    %c0_i32 = arith.constant 0 : i32
    %c0_i32_0 = arith.constant 0 : i32
    %c0_i32_1 = arith.constant 0 : i32
    return %c0_i32, %c0_i32_0 : i32, i32
  }
  func.func @transform_5(%arg0: i32) -> (i32, i32) {
    %c0_i32 = arith.constant 0 : i32
    %c0_i32_0 = arith.constant 0 : i32
    %c0_i32_1 = arith.constant 0 : i32
    return %c0_i32, %c0_i32_0 : i32, i32
  }
  func.func @transform_6(%arg0: i32) -> (i32, i32) {
    %c0_i32 = arith.constant 0 : i32
    %c0_i32_0 = arith.constant 0 : i32
    %c0_i32_1 = arith.constant 0 : i32
    return %c0_i32, %c0_i32_0 : i32, i32
  }
  func.func @transform_7(%arg0: i32) -> (i32, i32) {
    %c0_i32 = arith.constant 0 : i32
    %c0_i32_0 = arith.constant 0 : i32
    return %arg0, %c0_i32 : i32, i32
  }
}

</mosaic_0001>

<bundles_post_ra>
// kernel: tpu_custom_call.1
= control target key start
LH: loop header
LB: loop body
LE: loop exit
PB: predicated region body
PF: predicated region fallthrough
CT: control target
= control target key end

     0   :  { %s1175_s26 = smov 0   ;;  %s1346_s0 = inlined_call_operand.vmem [shape: f32[256,16], index: 0, kind: input, shape index: {}]   ;;  %s1347_s1 = inlined_call_operand.vmem [shape: f32[16,1], index: 1, kind: input, shape index: {}]   ;;  %s1348_s2 = inlined_call_operand.<no memory space> [shape: f32[1,1], index: 2, kind: input, shape index: {}]   ;;  %s1349_s3 = inlined_call_operand.vmem [shape: f32[1,32], index: 3, kind: input, shape index: {}]   ;;  %s1350_s4 = inlined_call_operand.vmem [shape: f32[1,32], index: 4, kind: input, shape index: {}]   ;;  %s1351_s5 = inlined_call_operand.vmem [shape: f32[32,8], index: 5, kind: input, shape index: {}]   ;;  %s1352_s6 = inlined_call_operand.vmem [shape: f32[1,8], index: 6, kind: input, shape index: {}]   ;;  %s1353_s7 = inlined_call_operand.vmem [shape: f32[256,8], index: 7, kind: output, shape index: {}]  }
   0x1   :  { %v12_v0 = vstv %s1348_s2 }
   0x2   :  { %13 = vst [vmem:[#allocation2] sm:$0x1] %v12_v0 }
   0x3 LB: > { %s955_s27 = sadd.s32 4294967295, %s1129_s26   ;;  %p959_p0 = scmp.ge.s32.totalorder %s1129_s26, 1  ;;  %s1129_s26 = sphi %s1175_s26, %s19_s26  }
   0x4   : > { %p240_p1 = scmp.lt.s32.totalorder %s1129_s26, 3 }
   0x6   : > { %p241_p2 = pnand %p959_p0, %p240_p1 }
   0x7   : > { %v300_v1 = vld [vmem:[%s1347_s1] sm:$0xff] (!%p241_p2)  ;;  %v301_v2 = vld [vmem:[%s1347_s1 + $0x8] sm:$0xff] (!%p241_p2)  ;;  %s960_s8 = sshll.u32 (!%p241_p2), %s955_s27, 4  ;;  %vm309_vm0 = vcmask (!%p241_p2), 130048   ;;  %v1131_v20 = vmov (!%p241_p2), 0   ;;  %v679_v33 = vld [vmem:[%s1351_s5 + $0x10] sm:$0xff] (!%p241_p2) }
   0x8   : > { %244 = sbr.rel (%p241_p2) target bundleno = 618 (0x26a), region = 48  ;;  %v1100_v3 = vpack.c.bf16 (!%p241_p2), %v301_v2, %v300_v1  ;;  %p273_p3 = scmp.lt.s32.totalorder (!%p241_p2), %s960_s8, 31  ;;  %1121 = vset.pattern.permute.xlu0 (!%p241_p2), %v1131_v20  ;;  %1122 = vset.pattern.permute.xlu1 (!%p241_p2), %v1131_v20  ;;  %v677_v26 = vld [vmem:[%s1351_s5] sm:$0xff] (!%p241_p2)  ;;  %v678_v27 = vld [vmem:[%s1351_s5 + $0x8] sm:$0xff] (!%p241_p2)  ;;  %v680_v34 = vld [vmem:[%s1351_s5 + $0x18] sm:$0xff] (!%p241_p2)  ;;  %vm688_vm1 = vcmask (!%p241_p2), 261120  }
   0x9   : > { %v964_v21 = vld [vmem:[#allocation2] ss:$0 sm:$0xff] (!%p241_p2)  ;;  %v1104_v29 = vpack.c.bf16 (!%p241_p2), %v678_v27, %v677_v26  ;;  %v1108_v36 = vpack.c.bf16 (!%p241_p2), %v680_v34, %v679_v33 }
   0xa   : > { %1101 = vmatprep.subr.bf16.mxu0 (!%p241_p2), %v1100_v3  ;;  %v1246_v60 = vld [vmem:[%s1349_s3] ss:$0 sm:$0xff] (!%p241_p2) }
   0xb   : > { %1103 = vmatpush3.bf16.msra.mxu0 (!%p241_p2), %v1100_v3  ;;  %1105 = vmatprep.subr.bf16.mxu1 (!%p241_p2), %v1104_v29  ;;  %v1251_v61 = vld [vmem:[%s1350_s4] ss:$0 sm:$0xff] (!%p241_p2) }
   0xc   : > { %1107 = vmatpush3.bf16.msra.mxu1 (!%p241_p2), %v1104_v29 }
   0xd   : > { %1109 = vmatprep.subr.bf16.mxu1 (!%p241_p2), %v1108_v36 }
   0xf   : > { %s1355_s8 = smov (!%p273_p3, %s960_s8), 31 }
  0x10   : > { %s961_s9 = sshll.u32 %s1355_s8, 3  ;;  %1111 = vmatpush3.bf16.msra.mxu1 %v1108_v36 }
  0x11   : > { %s1197_s12 = scalar_lea.vmem %s1346_s0, %s961_s9  ;;  %s1309_s2 = scalar_lea.vmem %s1353_s7, %s961_s9 }
  0x12   : > { %v284_v4 = vld [vmem:[%s1197_s12] sm:$0xff]  ;;  %v285_v5 = vld [vmem:[%s1197_s12 + $0x8] sm:$0xff]  ;;  %v286_v6 = vld [vmem:[%s1197_s12 + $0x10] sm:$0xff] }
  0x13   : > { %1044 = vmatprep.mubr.msk.f32.mxu0 %vm309_vm0, %v284_v4  ;;  %v287_v7 = vld [vmem:[%s1197_s12 + $0x18] sm:$0xff]  ;;  %v288_v8 = vld [vmem:[%s1197_s12 + $0x20] sm:$0xff]  ;;  %v289_v9 = vld [vmem:[%s1197_s12 + $0x28] sm:$0xff] }
  0x14   : > { %1045 = vmatmul.mubr.msk.f32.vlgmr.msra.gmra.mrb[0].mxu0 %vm309_vm0, %v285_v5  ;;  %v290_v10 = vld [vmem:[%s1197_s12 + $0x30] sm:$0xff]  ;;  %v291_v11 = vld [vmem:[%s1197_s12 + $0x38] sm:$0xff]  ;;  %v292_v12 = vld [vmem:[%s1197_s12 + $0x40] sm:$0xff] }
  0x15   : > { %1047 = vmatprep.mubr.msk.f32.mxu0 %vm309_vm0, %v286_v6  ;;  %v293_v13 = vld [vmem:[%s1197_s12 + $0x48] sm:$0xff]  ;;  %v294_v14 = vld [vmem:[%s1197_s12 + $0x50] sm:$0xff]  ;;  %v295_v15 = vld [vmem:[%s1197_s12 + $0x58] sm:$0xff] }
  0x16   : > { %v296_v16 = vld [vmem:[%s1197_s12 + $0x60] sm:$0xff]  ;;  %v297_v17 = vld [vmem:[%s1197_s12 + $0x68] sm:$0xff]  ;;  %v298_v18 = vld [vmem:[%s1197_s12 + $0x70] sm:$0xff] }
  0x17   : > { %v299_v19 = vld [vmem:[%s1197_s12 + $0x78] sm:$0xff] }
  0x18   : > { %1048 = vmatmul.mubr.msk.f32.gmra.mrb[2].mxu0 %vm309_vm0, %v287_v7 }
  0x19   : > { %1050 = vmatprep.mubr.msk.f32.mxu0 %vm309_vm0, %v288_v8 }
  0x1c   : > { %1051 = vmatmul.mubr.msk.f32.gmra.mrb[4].mxu0 %vm309_vm0, %v289_v9 }
  0x1d   : > { %1053 = vmatprep.mubr.msk.f32.mxu0 %vm309_vm0, %v290_v10 }
  0x20   : > { %1054 = vmatmul.mubr.msk.f32.gmra.mrb[6].mxu0 %vm309_vm0, %v291_v11 }
  0x21   : > { %1056 = vmatprep.mubr.msk.f32.mxu0 %vm309_vm0, %v292_v12 }
  0x24   : > { %1057 = vmatmul.mubr.msk.f32.gmra.mrb[8].mxu0 %vm309_vm0, %v293_v13 }
  0x25   : > { %1059 = vmatprep.mubr.msk.f32.mxu0 %vm309_vm0, %v294_v14 }
  0x28   : > { %1060 = vmatmul.mubr.msk.f32.gmra.mrb[10].mxu0 %vm309_vm0, %v295_v15 }
  0x29   : > { %1062 = vmatprep.mubr.msk.f32.mxu0 %vm309_vm0, %v296_v16 }
  0x2c   : > { %1063 = vmatmul.mubr.msk.f32.gmra.mrb[12].mxu0 %vm309_vm0, %v297_v17 }
  0x2d   : > { %1065 = vmatprep.mubr.msk.f32.mxu0 %vm309_vm0, %v298_v18 }
  0x30   : > { %1066 = vmatmul.mubr.msk.f32.gmra.mrb[14].mxu0 %vm309_vm0, %v299_v19 }
  0xe7   : > { %v1046_v22 = vpop.f32.mrb[0].mxu0 }
  0xe8   : > { %v424_v23 = vpop.f32.mrb[1].mxu0  ;;  %v430_v30 = vadd.f32 %v1046_v22, %v964_v21 }
  0xe9   : > { %v425_v24 = vadd.f32 %v964_v21, %v424_v23 }
  0xeb   : > { %v1049_v25 = vpop.f32.mrb[2].mxu0  ;;  %506 = vperm.xlu0 %1121, %v425_v24  }
  0xec   : > { %v434_v28 = vpop.f32.mrb[3].mxu0  ;;  %v440_v37 = vadd.f32 %v1049_v25, %v964_v21 }
  0xed   : > { %v435_v31 = vadd.f32 %v964_v21, %v434_v28 }
  0xef   : > { %v1052_v32 = vpop.f32.mrb[4].mxu0  ;;  %516 = vperm.xlu1 %1122, %v435_v31   ;;  %511 = vperm.xlu0 %1121, %v430_v30  }
  0xf0   : > { %v444_v35 = vpop.f32.mrb[5].mxu0  ;;  %v450_v41 = vadd.f32 %v1052_v32, %v964_v21 }
  0xf1   : > { %v445_v38 = vadd.f32 %v964_v21, %v444_v35 }
  0xf3   : > { %v1055_v39 = vpop.f32.mrb[6].mxu0  ;;  %521 = vperm.xlu1 %1122, %v440_v37   ;;  %526 = vperm.xlu0 %1121, %v445_v38  }
  0xf4   : > { %v454_v40 = vpop.f32.mrb[7].mxu0  ;;  %v460_v45 = vadd.f32 %v1055_v39, %v964_v21 }
  0xf5   : > { %v455_v42 = vadd.f32 %v964_v21, %v454_v40 }
  0xf7   : > { %v1058_v43 = vpop.f32.mrb[8].mxu0  ;;  %531 = vperm.xlu1 %1122, %v450_v41   ;;  %536 = vperm.xlu0 %1121, %v455_v42  }
  0xf8   : > { %v464_v44 = vpop.f32.mrb[9].mxu0  ;;  %v470_v49 = vadd.f32 %v1058_v43, %v964_v21 }
  0xf9   : > { %v465_v46 = vadd.f32 %v964_v21, %v464_v44 }
  0xfb   : > { %v1061_v47 = vpop.f32.mrb[10].mxu0  ;;  %541 = vperm.xlu1 %1122, %v460_v45   ;;  %546 = vperm.xlu0 %1121, %v465_v46  }
  0xfc   : > { %v474_v48 = vpop.f32.mrb[11].mxu0  ;;  %v480_v53 = vadd.f32 %v1061_v47, %v964_v21 }
  0xfd   : > { %v475_v50 = vadd.f32 %v964_v21, %v474_v48 }
  0xff   : > { %v1064_v51 = vpop.f32.mrb[12].mxu0  ;;  %551 = vperm.xlu1 %1122, %v470_v49   ;;  %556 = vperm.xlu0 %1121, %v475_v50  }
 0x100   : > { %v484_v52 = vpop.f32.mrb[13].mxu0  ;;  %v490_v57 = vadd.f32 %v1064_v51, %v964_v21 }
 0x101   : > { %v485_v54 = vadd.f32 %v964_v21, %v484_v52 }
 0x103   : > { %v1067_v55 = vpop.f32.mrb[14].mxu0  ;;  %561 = vperm.xlu1 %1122, %v480_v53   ;;  %566 = vperm.xlu0 %1121, %v485_v54  }
 0x104   : > { %v494_v56 = vpop.f32.mrb[15].mxu0  ;;  %v500_v59 = vadd.f32 %v1067_v55, %v964_v21 }
 0x105   : > { %v495_v58 = vadd.f32 %v964_v21, %v494_v56 }
 0x107   : > { %571 = vperm.xlu1 %1122, %v490_v57   ;;  %576 = vperm.xlu0 %1121, %v495_v58  }
 0x10b   : > { %581 = vperm.xlu1 %1122, %v500_v59  }
 0x16a   : > { %v507_v62 = vpop.permute.xlu0 %506 }
 0x16b   : > { %v590_v63 = vmul.f32 %v1246_v60, %v507_v62 }
 0x16d   : > { %v613_v0 = vadd.f32 %v1251_v61, %v590_v63 }
 0x16e   : > { %v517_v1 = vpop.permute.xlu1 %516  ;;  %v512_v2 = vpop.permute.xlu0 %511 }
 0x16f   : > { %v592_v3 = vmul.f32 %v1246_v60, %v517_v1  ;;  %v591_v4 = vmul.f32 %v1246_v60, %v512_v2  ;;  %vm629_vm2 = vcmp.gt.f32.partialorder %v613_v0, 0.0  ;;  %v645_v5 = vmul.f32 0.01, %v613_v0 }
 0x171   : > { %v615_v6 = vadd.f32 %v1251_v61, %v592_v3  ;;  %v614_v7 = vadd.f32 %v1251_v61, %v591_v4  ;;  %v661_v8 = vsel %vm629_vm2, %v613_v0, %v645_v5 }
 0x172   : > { %v522_v9 = vpop.permute.xlu1 %521  ;;  %1076 = vmatprep.mubr.msk.f32.mxu1 %vm688_vm1, %v661_v8  ;;  %v527_v10 = vpop.permute.xlu0 %526 }
 0x173   : > { %v647_v11 = vmul.f32 0.01, %v615_v6  ;;  %v646_v12 = vmul.f32 0.01, %v614_v7  ;;  %v593_v13 = vmul.f32 %v1246_v60, %v522_v9  ;;  %v594_v14 = vmul.f32 %v1246_v60, %v527_v10 }
 0x174   : > { %vm630_vm3 = vcmp.gt.f32.partialorder %v614_v7, 0.0  ;;  %vm631_vm4 = vcmp.gt.f32.partialorder %v615_v6, 0.0 }
 0x175   : > { %v616_v15 = vadd.f32 %v1251_v61, %v593_v13  ;;  %v617_v16 = vadd.f32 %v1251_v61, %v594_v14  ;;  %v662_v17 = vsel %vm630_vm3, %v614_v7, %v646_v12  ;;  %v663_v18 = vsel %vm631_vm4, %v615_v6, %v647_v11 }
 0x176   : > { %v532_v19 = vpop.permute.xlu1 %531  ;;  %1077 = vmatmul.mubr.msk.f32.vlgmr.msra.gmra.mrb[0].mxu1 %vm688_vm1, %v662_v17  ;;  %v537_v20 = vpop.permute.xlu0 %536  ;;  %vm882_vm3 = vcmask 64512  }
 0x177   : > { %v648_v21 = vmul.f32 0.01, %v616_v15  ;;  %v649_v22 = vmul.f32 0.01, %v617_v16  ;;  %v595_v23 = vmul.f32 %v1246_v60, %v532_v19  ;;  %v596_v24 = vmul.f32 %v1246_v60, %v537_v20  ;;  %1079 = vmatprep.mubr.msk.f32.mxu1 %vm688_vm1, %v663_v18 }
 0x178   : > { %vm632_vm5 = vcmp.gt.f32.partialorder %v616_v15, 0.0  ;;  %vm633_vm6 = vcmp.gt.f32.partialorder %v617_v16, 0.0 }
 0x179   : > { %v618_v25 = vadd.f32 %v1251_v61, %v595_v23  ;;  %v619_v26 = vadd.f32 %v1251_v61, %v596_v24  ;;  %v664_v27 = vsel %vm632_vm5, %v616_v15, %v648_v21  ;;  %v665_v28 = vsel %vm633_vm6, %v617_v16, %v649_v22 }
 0x17a   : > { %v542_v29 = vpop.permute.xlu1 %541  ;;  %1080 = vmatmul.mubr.msk.f32.gmra.mrb[2].mxu1 %vm688_vm1, %v664_v27  ;;  %v547_v30 = vpop.permute.xlu0 %546 }
 0x17b   : > { %v650_v31 = vmul.f32 0.01, %v618_v25  ;;  %v651_v32 = vmul.f32 0.01, %v619_v26  ;;  %v597_v33 = vmul.f32 %v1246_v60, %v542_v29  ;;  %v598_v34 = vmul.f32 %v1246_v60, %v547_v30  ;;  %1082 = vmatprep.mubr.msk.f32.mxu1 %vm688_vm1, %v665_v28 }
 0x17c   : > { %vm634_vm7 = vcmp.gt.f32.partialorder %v618_v25, 0.0  ;;  %vm635_vm8 = vcmp.gt.f32.partialorder %v619_v26, 0.0 }
 0x17d   : > { %v620_v35 = vadd.f32 %v1251_v61, %v597_v33  ;;  %v621_v36 = vadd.f32 %v1251_v61, %v598_v34  ;;  %v666_v37 = vsel %vm634_vm7, %v618_v25, %v650_v31  ;;  %v667_v38 = vsel %vm635_vm8, %v619_v26, %v651_v32 }
 0x17e   : > { %v552_v39 = vpop.permute.xlu1 %551  ;;  %1083 = vmatmul.mubr.msk.f32.gmra.mrb[4].mxu1 %vm688_vm1, %v666_v37  ;;  %v557_v40 = vpop.permute.xlu0 %556 }
 0x17f   : > { %v652_v41 = vmul.f32 0.01, %v620_v35  ;;  %v653_v42 = vmul.f32 0.01, %v621_v36  ;;  %v599_v43 = vmul.f32 %v1246_v60, %v552_v39  ;;  %v600_v44 = vmul.f32 %v1246_v60, %v557_v40  ;;  %1085 = vmatprep.mubr.msk.f32.mxu1 %vm688_vm1, %v667_v38 }
 0x180   : > { %vm636_vm9 = vcmp.gt.f32.partialorder %v620_v35, 0.0  ;;  %vm637_vm10 = vcmp.gt.f32.partialorder %v621_v36, 0.0 }
 0x181   : > { %v622_v45 = vadd.f32 %v1251_v61, %v599_v43  ;;  %v623_v46 = vadd.f32 %v1251_v61, %v600_v44  ;;  %v668_v47 = vsel %vm636_vm9, %v620_v35, %v652_v41  ;;  %v669_v48 = vsel %vm637_vm10, %v621_v36, %v653_v42 }
 0x182   : > { %v562_v49 = vpop.permute.xlu1 %561  ;;  %1086 = vmatmul.mubr.msk.f32.gmra.mrb[6].mxu1 %vm688_vm1, %v668_v47  ;;  %v567_v50 = vpop.permute.xlu0 %566 }
 0x183   : > { %v654_v51 = vmul.f32 0.01, %v622_v45  ;;  %v655_v52 = vmul.f32 0.01, %v623_v46  ;;  %v601_v53 = vmul.f32 %v1246_v60, %v562_v49  ;;  %v602_v54 = vmul.f32 %v1246_v60, %v567_v50  ;;  %1088 = vmatprep.mubr.msk.f32.mxu1 %vm688_vm1, %v669_v48 }
 0x184   : > { %vm638_vm11 = vcmp.gt.f32.partialorder %v622_v45, 0.0  ;;  %vm639_vm12 = vcmp.gt.f32.partialorder %v623_v46, 0.0 }
 0x185   : > { %v624_v55 = vadd.f32 %v1251_v61, %v601_v53  ;;  %v625_v56 = vadd.f32 %v1251_v61, %v602_v54  ;;  %v670_v57 = vsel %vm638_vm11, %v622_v45, %v654_v51  ;;  %v671_v58 = vsel %vm639_vm12, %v623_v46, %v655_v52 }
 0x186   : > { %v572_v59 = vpop.permute.xlu1 %571  ;;  %1089 = vmatmul.mubr.msk.f32.gmra.mrb[8].mxu1 %vm688_vm1, %v670_v57  ;;  %v577_v62 = vpop.permute.xlu0 %576 }
 0x187   : > { %v656_v63 = vmul.f32 0.01, %v624_v55  ;;  %v657_v0 = vmul.f32 0.01, %v625_v56  ;;  %v603_v1 = vmul.f32 %v1246_v60, %v572_v59  ;;  %v604_v2 = vmul.f32 %v1246_v60, %v577_v62  ;;  %1091 = vmatprep.mubr.msk.f32.mxu1 %vm688_vm1, %v671_v58 }
 0x188   : > { %vm640_vm13 = vcmp.gt.f32.partialorder %v624_v55, 0.0  ;;  %vm641_vm14 = vcmp.gt.f32.partialorder %v625_v56, 0.0 }
 0x189   : > { %v626_v3 = vadd.f32 %v1251_v61, %v603_v1  ;;  %v627_v4 = vadd.f32 %v1251_v61, %v604_v2  ;;  %v672_v5 = vsel %vm640_vm13, %v624_v55, %v656_v63  ;;  %v673_v6 = vsel %vm641_vm14, %v625_v56, %v657_v0 }
 0x18a   : > { %v582_v7 = vpop.permute.xlu1 %581  ;;  %1092 = vmatmul.mubr.msk.f32.gmra.mrb[10].mxu1 %vm688_vm1, %v672_v5 }
 0x18b   : > { %v658_v8 = vmul.f32 0.01, %v626_v3  ;;  %v659_v9 = vmul.f32 0.01, %v627_v4  ;;  %v605_v10 = vmul.f32 %v1246_v60, %v582_v7  ;;  %1094 = vmatprep.mubr.msk.f32.mxu1 %vm688_vm1, %v673_v6  ;;  %vm642_vm15 = vcmp.gt.f32.partialorder %v626_v3, 0.0 }
 0x18c   : > { %vm643_vm0 = vcmp.gt.f32.partialorder %v627_v4, 0.0  ;;  %v983_v60 = vld [vmem:[%s1352_s6] ss:$0 sm:$0xff] }
 0x18d   : > { %v628_v11 = vadd.f32 %v1251_v61, %v605_v10  ;;  %v674_v12 = vsel %vm642_vm15, %v626_v3, %v658_v8  ;;  %v675_v13 = vsel %vm643_vm0, %v627_v4, %v659_v9 }
 0x18e   : > { %1095 = vmatmul.mubr.msk.f32.gmra.mrb[12].mxu1 %vm688_vm1, %v674_v12 }
 0x18f   : > { %v660_v14 = vmul.f32 0.01, %v628_v11  ;;  %1097 = vmatprep.mubr.msk.f32.mxu1 %vm688_vm1, %v675_v13  ;;  %vm644_vm2 = vcmp.gt.f32.partialorder %v628_v11, 0.0 }
 0x191   : > { %v676_v15 = vsel %vm644_vm2, %v628_v11, %v660_v14 }
 0x192   : > { %1098 = vmatmul.mubr.msk.f32.gmra.mrb[14].mxu1 %vm688_vm1, %v676_v15 }
 0x249   : > { %v1078_v61 = vpop.f32.mrb[0].mxu1 }
 0x24a   : > { %v809_v16 = vadd.f32 %v1078_v61, %v983_v60  ;;  %v803_v17 = vpop.f32.mrb[1].mxu1 }
 0x24b   : > { %v804_v18 = vadd.f32 %v983_v60, %v803_v17 }
 0x24c   : > { %884 = vst.msk [vmem:[%s1309_s2 + $0x8] sm:$0xff] %vm882_vm3, %v809_v16 }
 0x24d   : > { %883 = vst.msk [vmem:[%s1309_s2] sm:$0xff] %vm882_vm3, %v804_v18  ;;  %v1081_v19 = vpop.f32.mrb[2].mxu1 }
 0x24e   : > { %v819_v20 = vadd.f32 %v1081_v19, %v983_v60  ;;  %v813_v21 = vpop.f32.mrb[3].mxu1 }
 0x24f   : > { %v814_v22 = vadd.f32 %v983_v60, %v813_v21 }
 0x250   : > { %886 = vst.msk [vmem:[%s1309_s2 + $0x18] sm:$0xff] %vm882_vm3, %v819_v20 }
 0x251   : > { %885 = vst.msk [vmem:[%s1309_s2 + $0x10] sm:$0xff] %vm882_vm3, %v814_v22  ;;  %v1084_v23 = vpop.f32.mrb[4].mxu1 }
 0x252   : > { %v829_v24 = vadd.f32 %v1084_v23, %v983_v60  ;;  %v823_v25 = vpop.f32.mrb[5].mxu1 }
 0x253   : > { %v824_v26 = vadd.f32 %v983_v60, %v823_v25 }
 0x254   : > { %888 = vst.msk [vmem:[%s1309_s2 + $0x28] sm:$0xff] %vm882_vm3, %v829_v24 }
 0x255   : > { %887 = vst.msk [vmem:[%s1309_s2 + $0x20] sm:$0xff] %vm882_vm3, %v824_v26  ;;  %v1087_v27 = vpop.f32.mrb[6].mxu1 }
 0x256   : > { %v839_v28 = vadd.f32 %v1087_v27, %v983_v60  ;;  %v833_v29 = vpop.f32.mrb[7].mxu1 }
 0x257   : > { %v834_v30 = vadd.f32 %v983_v60, %v833_v29 }
 0x258   : > { %890 = vst.msk [vmem:[%s1309_s2 + $0x38] sm:$0xff] %vm882_vm3, %v839_v28 }
 0x259   : > { %889 = vst.msk [vmem:[%s1309_s2 + $0x30] sm:$0xff] %vm882_vm3, %v834_v30  ;;  %v1090_v31 = vpop.f32.mrb[8].mxu1 }
 0x25a   : > { %v849_v32 = vadd.f32 %v1090_v31, %v983_v60  ;;  %v843_v33 = vpop.f32.mrb[9].mxu1 }
 0x25b   : > { %v844_v34 = vadd.f32 %v983_v60, %v843_v33 }
 0x25c   : > { %892 = vst.msk [vmem:[%s1309_s2 + $0x48] sm:$0xff] %vm882_vm3, %v849_v32 }
 0x25d   : > { %891 = vst.msk [vmem:[%s1309_s2 + $0x40] sm:$0xff] %vm882_vm3, %v844_v34  ;;  %v1093_v35 = vpop.f32.mrb[10].mxu1 }
 0x25e   : > { %v859_v36 = vadd.f32 %v1093_v35, %v983_v60  ;;  %v853_v37 = vpop.f32.mrb[11].mxu1 }
 0x25f   : > { %v854_v38 = vadd.f32 %v983_v60, %v853_v37 }
 0x260   : > { %894 = vst.msk [vmem:[%s1309_s2 + $0x58] sm:$0xff] %vm882_vm3, %v859_v36 }
 0x261   : > { %893 = vst.msk [vmem:[%s1309_s2 + $0x50] sm:$0xff] %vm882_vm3, %v854_v38  ;;  %v1096_v39 = vpop.f32.mrb[12].mxu1 }
 0x262   : > { %v869_v40 = vadd.f32 %v1096_v39, %v983_v60  ;;  %v863_v41 = vpop.f32.mrb[13].mxu1 }
 0x263   : > { %v864_v42 = vadd.f32 %v983_v60, %v863_v41 }
 0x264   : > { %896 = vst.msk [vmem:[%s1309_s2 + $0x68] sm:$0xff] %vm882_vm3, %v869_v40 }
 0x265   : > { %895 = vst.msk [vmem:[%s1309_s2 + $0x60] sm:$0xff] %vm882_vm3, %v864_v42  ;;  %v1099_v43 = vpop.f32.mrb[14].mxu1 }
 0x266   : > { %v879_v44 = vadd.f32 %v1099_v43, %v983_v60  ;;  %v873_v45 = vpop.f32.mrb[15].mxu1 }
 0x267   : > { %v874_v46 = vadd.f32 %v983_v60, %v873_v45 }
 0x268   : > { %898 = vst.msk [vmem:[%s1309_s2 + $0x78] sm:$0xff] %vm882_vm3, %v879_v44 }
 0x269   : > { %897 = vst.msk [vmem:[%s1309_s2 + $0x70] sm:$0xff] %vm882_vm3, %v874_v46 }
 0x26a PF: > { %s19_s26 = sadd.s32 1, %s1129_s26  }
 0x26b   : > { %p16_p4 = scmp.ge.s32.totalorder %s19_s26, 4  }
 0x26d   :  { %18 = sbr.rel (!%p16_p4) target bundleno = 3 (0x3), region = 78 }

</bundles_post_ra>
